<compile_context>
chip_gen: v7x
topology: tpu7x:2x2x1
jax: 0.10.0
libtpu: 0.0.40
codegen_flags: <defaults>
</compile_context>

<pallas_src>
import functools
import math

import jax
import jax.numpy as jnp
from jax import lax
from jax.experimental import pallas as pl
from jax.experimental.pallas import tpu as pltpu


# ----------------------------------------------------------------------------
# helpers
# ----------------------------------------------------------------------------
def _pick_tile(dim, target, quantum):
    """Largest tile <= target that divides dim and is a multiple of quantum,
    else the full dim (a full extent is always a legal block size)."""
    if dim <= target:
        return dim
    t = (target // quantum) * quantum
    while t >= quantum:
        if dim % t == 0:
            return t
        t -= quantum
    return dim


@functools.lru_cache(maxsize=1)
def _vmem_limit_bytes():
    """Per-generation scoped-VMEM budget (v5e/v6e: 128 MiB phys, v7x: 64 MiB)."""
    try:
        cap = int(pltpu.get_tpu_info().vmem_capacity_bytes)
    except Exception:
        cap = 64 * 1024 * 1024  # conservative fallback (v7x physical)
    return int(min(cap * 3 // 4, 100 * 1024 * 1024))


# ----------------------------------------------------------------------------
# Linear kernels:  out = x @ W + b  with W already in (Din, Dout) orientation
# ----------------------------------------------------------------------------
def _linear_resident_kernel(x_ref, w_ref, b_ref, o_ref):
    # Whole weight resident in VMEM (constant block index -> fetched once).
    acc = jnp.dot(x_ref[...], w_ref[...], preferred_element_type=jnp.float32)
    o_ref[...] = (acc + b_ref[...]).astype(o_ref.dtype)


def _linear_tiled_kernel(x_ref, w_ref, b_ref, o_ref, acc_ref):
    @pl.when(pl.program_id(2) == 0)
    def _():
        acc_ref[...] = jnp.zeros_like(acc_ref)

    acc_ref[...] += jnp.dot(x_ref[...], w_ref[...],
                            preferred_element_type=jnp.float32)

    @pl.when(pl.program_id(2) == pl.num_programs(2) - 1)
    def _():
        o_ref[...] = (acc_ref[...] + b_ref[...]).astype(o_ref.dtype)


_WEIGHT_RESIDENT_BYTES = 12 * 1024 * 1024


def linear(x2d, w_t, b, out_dtype):
    """x2d: (M, Din); w_t: (Din, Dout) — torch weight transposed once in the
    wrapper (any static scale already folded in); b: (Dout,) f32."""
    M, K = x2d.shape
    N = w_t.shape[1]
    b2d = b.reshape(1, N).astype(jnp.float32)
    vmem_limit = _vmem_limit_bytes()

    w_bytes = w_t.size * jnp.dtype(w_t.dtype).itemsize
    if w_bytes <= _WEIGHT_RESIDENT_BYTES:
        tm = _pick_tile(M, 512, 8)
        return pl.pallas_call(
            _linear_resident_kernel,
            out_shape=jax.ShapeDtypeStruct((M, N), out_dtype),
            grid_spec=pltpu.PrefetchScalarGridSpec(
                num_scalar_prefetch=0,
                grid=(M // tm,),
                in_specs=[
                    pl.BlockSpec((tm, K), lambda i: (i, 0)),
                    pl.BlockSpec((K, N), lambda i: (0, 0)),   # weight-resident
                    pl.BlockSpec((1, N), lambda i: (0, 0)),
                ],
                out_specs=pl.BlockSpec((tm, N), lambda i: (i, 0)),
            ),
            compiler_params=pltpu.CompilerParams(
                dimension_semantics=("parallel",),
                vmem_limit_bytes=vmem_limit,
            ),
        )(x2d, w_t, b2d)

    # Large-weight fallback: 3-D tiled grid with f32 VMEM accumulator.
    tm = _pick_tile(M, 512, 8)
    tn = _pick_tile(N, 512, 128)
    tk = _pick_tile(K, 512, 128)
    return pl.pallas_call(
        _linear_tiled_kernel,
        out_shape=jax.ShapeDtypeStruct((M, N), out_dtype),
        grid_spec=pltpu.PrefetchScalarGridSpec(
            num_scalar_prefetch=0,
            grid=(M // tm, N // tn, K // tk),
            in_specs=[
                pl.BlockSpec((tm, tk), lambda i, j, kk: (i, kk)),
                pl.BlockSpec((tk, tn), lambda i, j, kk: (kk, j)),
                pl.BlockSpec((1, tn), lambda i, j, kk: (0, j)),
            ],
            out_specs=pl.BlockSpec((tm, tn), lambda i, j, kk: (i, j)),
            scratch_shapes=[pltpu.VMEM((tm, tn), jnp.float32)],
        ),
        compiler_params=pltpu.CompilerParams(
            dimension_semantics=("parallel", "parallel", "arbitrary"),
            vmem_limit_bytes=vmem_limit,
        ),
    )(x2d, w_t, b2d)


# ----------------------------------------------------------------------------
# Fused adaptive attention kernel — flash-style online softmax over nk tiles,
# all heads of one (batch, q-tile) per grid step, fused (seq, h*d) layout.
# ----------------------------------------------------------------------------
def _adaptive_attn_kernel(q_ref, k_ref, s_ref, v_ref, mask_ref, o_ref,
                          m_scr, l_scr, acc_scr, *, h, d_k, d_v, compute_dtype):
    ki = pl.program_id(2)
    q = q_ref[0]          # (tq, h*d_k)  compute dtype; 1/sqrt(d_k) pre-folded
    k = k_ref[0]          # (tkv, h*d_k)
    s = s_ref[0]          # (tq, h*d_k)
    v = v_ref[0]          # (tkv, h*d_v)

    @pl.when(ki == 0)
    def _init():
        # Fold the adaptive "language token" in as the first virtual key:
        # running max = lang logit, running sum = 1, accumulator = s_h.
        for hh in range(h):
            qh = q[:, hh * d_k:(hh + 1) * d_k].astype(jnp.float32)
            sh = s[:, hh * d_k:(hh + 1) * d_k].astype(jnp.float32)
            lang = jnp.sum(qh * sh, axis=-1, keepdims=True)        # (tq, 1)
            m_scr[hh] = lang
            l_scr[hh] = jnp.ones_like(lang)
            acc_scr[hh] = sh

    # Additive mask bias, hoisted out of the per-head loop (one VPU pass/tile).
    bias = jnp.where(mask_ref[0] > 0, jnp.float32(-1e30), jnp.float32(0.0))  # (1, tkv)

    for hh in range(h):   # static unroll over heads; per-head 2-D MXU matmuls
        qh = q[:, hh * d_k:(hh + 1) * d_k]
        kh = k[:, hh * d_k:(hh + 1) * d_k]
        vh = v[:, hh * d_v:(hh + 1) * d_v]

        # QK^T without materializing a transpose (contract last dim of both).
        attn = lax.dot_general(
            qh, kh, dimension_numbers=(((1,), (1,)), ((), ())),
            preferred_element_type=jnp.float32) + bias             # (tq, tkv)

        m_prev = m_scr[hh]                                         # (tq, 1)
        m_new = jnp.maximum(m_prev, jnp.max(attn, axis=-1, keepdims=True))
        alpha = jnp.exp(m_prev - m_new)
        p = jnp.exp(attn - m_new)                                  # (tq, tkv) f32
        l_scr[hh] = alpha * l_scr[hh] + jnp.sum(p, axis=-1, keepdims=True)
        acc_scr[hh] = alpha * acc_scr[hh] + lax.dot_general(
            p.astype(compute_dtype), vh,
            dimension_numbers=(((1,), (0,)), ((), ())),
            preferred_element_type=jnp.float32)
        m_scr[hh] = m_new

    @pl.when(ki == pl.num_programs(2) - 1)
    def _finalize():
        outs = [acc_scr[hh] * pl.reciprocal(l_scr[hh], approx=True)   # EUP slot
                for hh in range(h)]
        # single lane-dense store: last dim = h*d_v
        o_ref[0] = jnp.concatenate(outs, axis=-1).astype(o_ref.dtype)


def adaptive_attention_core(q, k, s, v, mask, *, h, d_k, d_v, out_dtype):
    """q,s: (b, nq, h*d_k); k: (b, nk, h*d_k); v: (b, nk, h*d_v);
    mask: (b, 1, nk) int32 (>0 = masked) -> (b, nq, h*d_v) in out_dtype."""
    b_s, nq, HDK = q.shape
    nk = k.shape[1]
    HDV = v.shape[2]
    compute_dtype = q.dtype

    tq = _pick_tile(nq, 256, 8)
    if b_s * (nq // tq) < 2:        # keep >= 2 parallel steps for v7x's 2 TCs
        tq = _pick_tile(nq, max(8, nq // 2), 8)
    tkv = _pick_tile(nk, 512, 128)  # multiple of 128 (mask lane dim) or full nk

    kernel = functools.partial(_adaptive_attn_kernel, h=h, d_k=d_k, d_v=d_v,
                               compute_dtype=compute_dtype)
    return pl.pallas_call(
        kernel,
        out_shape=jax.ShapeDtypeStruct((b_s, nq, HDV), out_dtype),
        grid_spec=pltpu.PrefetchScalarGridSpec(
            num_scalar_prefetch=0,
            grid=(b_s, nq // tq, nk // tkv),
            in_specs=[
                pl.BlockSpec((1, tq, HDK), lambda b, qi, ki: (b, qi, 0)),
                pl.BlockSpec((1, tkv, HDK), lambda b, qi, ki: (b, ki, 0)),
                pl.BlockSpec((1, tq, HDK), lambda b, qi, ki: (b, qi, 0)),
                pl.BlockSpec((1, tkv, HDV), lambda b, qi, ki: (b, ki, 0)),
                pl.BlockSpec((1, 1, tkv), lambda b, qi, ki: (b, 0, ki)),
            ],
            out_specs=pl.BlockSpec((1, tq, HDV), lambda b, qi, ki: (b, qi, 0)),
            scratch_shapes=[
                pltpu.VMEM((h, tq, 1), jnp.float32),    # running max
                pltpu.VMEM((h, tq, 1), jnp.float32),    # running sum
                pltpu.VMEM((h, tq, d_v), jnp.float32),  # output accumulator
            ],
        ),
        compiler_params=pltpu.CompilerParams(
            dimension_semantics=("parallel", "parallel", "arbitrary"),
            vmem_limit_bytes=_vmem_limit_bytes(),
        ),
    )(q, k, s, v, mask)


# ----------------------------------------------------------------------------
# Full module forward
# ----------------------------------------------------------------------------
def adaptive_sdpa_forward(params, queries, keys, values, attention_mask,
                          language_signals, *, h, d_k, d_v, use_bf16=True):
    assert language_signals is not None
    assert d_k == d_v, "module semantics require d_k == d_v (p_lang * s added to output)"
    b_s, nq, d_model = queries.shape
    nk = keys.shape[1]
    HDK, HDV = h * d_k, h * d_v
    cd = jnp.bfloat16 if use_bf16 else jnp.float32

    # One-time weight prep: transpose to (Din, Dout) canonical MXU orientation,
    # fold 1/sqrt(d_k) into Wq/bq, cast weights to the compute dtype.
    scale = 1.0 / math.sqrt(d_k)
    wq_t = (params["wq"].T * scale).astype(cd)
    bq = params["bq"].astype(jnp.float32) * scale
    wk_t = params["wk"].T.astype(cd)
    ws_t = params["ws"].T.astype(cd)
    wv_t = params["wv"].T.astype(cd)
    wo_t = params["wo"].T.astype(cd)
    bk = params["bk"].astype(jnp.float32)
    bs = params["bs"].astype(jnp.float32)
    bv = params["bv"].astype(jnp.float32)
    bo = params["bo"].astype(jnp.float32)

    # Projections: fused (b, seq, h*d) layout, activations in compute dtype.
    qx = queries.reshape(-1, d_model).astype(cd)
    sx = language_signals.reshape(-1, d_model).astype(cd)
    kx = keys.reshape(-1, d_model).astype(cd)
    vx = values.reshape(-1, d_model).astype(cd)
    q = linear(qx, wq_t, bq, out_dtype=cd).reshape(b_s, nq, HDK)
    s = linear(sx, ws_t, bs, out_dtype=cd).reshape(b_s, nq, HDK)
    k = linear(kx, wk_t, bk, out_dtype=cd).reshape(b_s, nk, HDK)
    v = linear(vx, wv_t, bv, out_dtype=cd).reshape(b_s, nk, HDV)

    # Compact per-row padding mask (b, 1, nk) int32.
    # TODO(synk): per-query / per-head masks would need a (b, h, nq, nk) path;
    # the broadcast_to below raises (rather than silently mis-masking) on those.
    if attention_mask is None:
        mask = jnp.zeros((b_s, 1, nk), jnp.int32)
    else:
        am = jnp.asarray(attention_mask)
        mask = jnp.broadcast_to(am, (b_s, 1, 1, nk)).reshape(b_s, 1, nk).astype(jnp.int32)

    out = adaptive_attention_core(q, k, s, v, mask, h=h, d_k=d_k, d_v=d_v,
                                  out_dtype=cd)              # (b, nq, h*d_v)

    out = linear(out.reshape(-1, HDV), wo_t, bo, out_dtype=jnp.float32)
    return out.reshape(b_s, nq, d_model)
    # Note: nn.Dropout is defined in the PyTorch __init__ but never applied in
    # forward, so there is nothing to translate for it.


# ----------------------------------------------------------------------------
# Pure-JAX reference (mirrors the PyTorch forward) for correctness checks
# ----------------------------------------------------------------------------
def reference_forward(params, queries, keys, values, attention_mask,
                      language_signals, *, h, d_k, d_v):
    b_s, nq, d_model = queries.shape
    nk = keys.shape[1]
    lin = lambda x, w, b: x @ w.T + b
    q = lin(queries, params["wq"], params["bq"]).reshape(b_s, nq, h, d_k).transpose(0, 2, 1, 3)
    s = lin(language_signals, params["ws"], params["bs"]).reshape(b_s, nq, h, d_k).transpose(0, 2, 1, 3)
    k = lin(keys, params["wk"], params["bk"]).reshape(b_s, nk, h, d_k).transpose(0, 2, 1, 3)
    v = lin(values, params["wv"], params["bv"]).reshape(b_s, nk, h, d_v).transpose(0, 2, 1, 3)
    scale = 1.0 / jnp.sqrt(jnp.float32(d_k))
    attn = jnp.einsum('bhqd,bhkd->bhqk', q, k) * scale
    if attention_mask is not None:
        attn = jnp.where(jnp.broadcast_to(attention_mask, attn.shape), -jnp.inf, attn)
    lang = jnp.einsum('bhqd,bhqd->bhq', q, s) * scale
    combined = jnp.concatenate([attn, lang[..., None]], axis=-1)   # (b,h,nq,nk+1)
    p = jax.nn.softmax(combined, axis=-1)
    out = jnp.einsum('bhqk,bhkd->bhqd', p[..., :nk], v) + p[..., nk:] * s
    out = out.transpose(0, 2, 1, 3).reshape(b_s, nq, h * d_v)
    return lin(out, params["wo"], params["bo"])


# ----------------------------------------------------------------------------
# Deterministic parameter init (xavier uniform weights, zero biases)
# ----------------------------------------------------------------------------
def xavier_uniform(key, out_f, in_f):
    limit = jnp.sqrt(6.0 / (in_f + out_f))
    return jax.random.uniform(key, (out_f, in_f), jnp.float32, -limit, limit)


def init_params(key, d_model, d_k, d_v, h):
    ks = jax.random.split(key, 5)
    return {
        "wq": xavier_uniform(ks[0], h * d_k, d_model), "bq": jnp.zeros((h * d_k,), jnp.float32),
        "wk": xavier_uniform(ks[1], h * d_k, d_model), "bk": jnp.zeros((h * d_k,), jnp.float32),
        "wv": xavier_uniform(ks[2], h * d_v, d_model), "bv": jnp.zeros((h * d_v,), jnp.float32),
        "ws": xavier_uniform(ks[3], h * d_k, d_model), "bs": jnp.zeros((h * d_k,), jnp.float32),
        "wo": xavier_uniform(ks[4], d_model, h * d_v), "bo": jnp.zeros((d_model,), jnp.float32),
    }


if __name__ == "__main__":
    root = jax.random.PRNGKey(0)

    def run_case(case_idx, b_s, nq, nk, d_model, d_k, d_v, h,
                 f32_tol, bf16_tol):
        key = jax.random.fold_in(root, case_idx)
        kq, kk_, kv, kl, km, kp = jax.random.split(key, 6)
        queries = jax.random.normal(kq, (b_s, nq, d_model), jnp.float32)
        keys = jax.random.normal(kk_, (b_s, nk, d_model), jnp.float32)
        values = jax.random.normal(kv, (b_s, nk, d_model), jnp.float32)
        language_signals = jax.random.normal(kl, (b_s, nq, d_model), jnp.float32)
        # boolean padding mask, True = masked; shaped (b, 1, 1, nk)
        attention_mask = (jax.random.uniform(km, (b_s, 1, 1, nk)) > 0.7)
        params = init_params(kp, d_model, d_k, d_v, h)

        ref = reference_forward(params, queries, keys, values, attention_mask,
                                language_signals, h=h, d_k=d_k, d_v=d_v)

        out_f32 = adaptive_sdpa_forward(params, queries, keys, values,
                                        attention_mask, language_signals,
                                        h=h, d_k=d_k, d_v=d_v, use_bf16=False)
        out_f32 = jax.block_until_ready(out_f32)
        assert out_f32.shape == (b_s, nq, d_model)
        assert jnp.allclose(out_f32, ref, atol=f32_tol, rtol=f32_tol), \
            f"f32 path mismatch vs reference (case {case_idx})"

        out_bf16 = adaptive_sdpa_forward(params, queries, keys, values,
                                         attention_mask, language_signals,
                                         h=h, d_k=d_k, d_v=d_v, use_bf16=True)
        out_bf16 = jax.block_until_ready(out_bf16)
        assert jnp.allclose(out_bf16, ref, atol=bf16_tol, rtol=bf16_tol), \
            f"bf16 path mismatch vs reference (case {case_idx})"

    # Small shapes consistent with the module.
    run_case(0, b_s=2, nq=8, nk=8, d_model=32, d_k=16, d_v=16, h=2,
             f32_tol=2e-2, bf16_tol=8e-2)
    # Exercises nk tiling: tkv=512 -> 2 kv tiles, online softmax across tiles.
    run_case(1, b_s=2, nq=16, nk=1024, d_model=64, d_k=32, d_v=32, h=2,
             f32_tol=5e-2, bf16_tol=1.5e-1)

    print("KERNEL_OK")
</pallas_src>

<mosaic_0001>
module attributes {stable_mosaic.version = 11 : i64} {
  func.func @_linear_resident_kernel(%arg0: i32, %arg1: memref<16x32xf32, #tpu.memory_space<vmem>>, %arg2: memref<32x32xf32, #tpu.memory_space<vmem>>, %arg3: memref<1x32xf32, #tpu.memory_space<vmem>>, %arg4: memref<16x32xf32, #tpu.memory_space<vmem>>) attributes {dimension_semantics = [#tpu.dimension_semantics<parallel>], iteration_bounds = array<i64: 1>, scalar_prefetch = 0 : i64, scratch_operands = 0 : i64, tpu.core_type = #tpu.core_type<tc>, window_params = [{transform_indices = @transform_0, window_bounds = array<i64: 16, 32>}, {pipeline_mode = #tpu.pipeline_mode<synchronous>, transform_indices = @transform_1, window_bounds = array<i64: 32, 32>}, {pipeline_mode = #tpu.pipeline_mode<synchronous>, transform_indices = @transform_2, window_bounds = array<i64: 1, 32>}, {transform_indices = @transform_3, window_bounds = array<i64: 16, 32>}]} {
    %c0 = arith.constant 0 : index
    %c0_0 = arith.constant 0 : index
    %0 = vector.load %arg1[%c0, %c0_0] : memref<16x32xf32, #tpu.memory_space<vmem>>, vector<16x32xf32>
    %c0_1 = arith.constant 0 : index
    %c0_2 = arith.constant 0 : index
    %1 = vector.load %arg2[%c0_1, %c0_2] : memref<32x32xf32, #tpu.memory_space<vmem>>, vector<32x32xf32>
    %cst = arith.constant dense<0.000000e+00> : vector<16x32xf32>
    %2 = tpu.matmul %0, %1, %cst {dimension_numbers = #tpu.dot_dimension_numbers<[1], [0], [0], [1], [0, 0, 1, 1], [], []>} : vector<16x32xf32>, vector<32x32xf32>, vector<16x32xf32> -> vector<16x32xf32>
    %c0_3 = arith.constant 0 : index
    %c0_4 = arith.constant 0 : index
    %3 = vector.load %arg3[%c0_3, %c0_4] : memref<1x32xf32, #tpu.memory_space<vmem>>, vector<1x32xf32>
    %4 = vector.broadcast %3 : vector<1x32xf32> to vector<16x32xf32>
    %5 = arith.addf %2, %4 : vector<16x32xf32>
    %c0_5 = arith.constant 0 : index
    %c0_6 = arith.constant 0 : index
    %6 = vector.load %arg4[%c0_5, %c0_6] : memref<16x32xf32, #tpu.memory_space<vmem>>, vector<16x32xf32>
    tpu.vector_store %arg4[%c0_5, %c0_6], %5 {strides = array<i32>} : memref<16x32xf32, #tpu.memory_space<vmem>>, vector<16x32xf32>,
    return
  }
  func.func @transform_0(%arg0: i32) -> (i32, i32) {
    %c0_i32 = arith.constant 0 : i32
    %c0_i32_0 = arith.constant 0 : i32
    return %arg0, %c0_i32 : i32, i32
  }
  func.func @transform_1(%arg0: i32) -> (i32, i32) {
    %c0_i32 = arith.constant 0 : i32
    %c0_i32_0 = arith.constant 0 : i32
    %c0_i32_1 = arith.constant 0 : i32
    return %c0_i32, %c0_i32_0 : i32, i32
  }
  func.func @transform_2(%arg0: i32) -> (i32, i32) {
    %c0_i32 = arith.constant 0 : i32
    %c0_i32_0 = arith.constant 0 : i32
    %c0_i32_1 = arith.constant 0 : i32
    return %c0_i32, %c0_i32_0 : i32, i32
  }
  func.func @transform_3(%arg0: i32) -> (i32, i32) {
    %c0_i32 = arith.constant 0 : i32
    %c0_i32_0 = arith.constant 0 : i32
    return %arg0, %c0_i32 : i32, i32
  }
}

</mosaic_0001>

<bundles_post_ra>
// kernel: tpu_custom_call.1
= control target key start
LH: loop header
LB: loop body
LE: loop exit
PB: predicated region body
PF: predicated region fallthrough
CT: control target
= control target key end

     0   :  { %8 = vsyncpa [#allocation3], 0  ;;  %s340_s0 = inlined_call_operand.hbm [shape: f32[16,32], index: 0, kind: input, shape index: {}]   ;;  %s341_s1 = inlined_call_operand.hbm [shape: f32[32,32], index: 1, kind: input, shape index: {}]   ;;  %s342_s2 = inlined_call_operand.vmem [shape: f32[1,32], index: 2, kind: input, shape index: {}]   ;;  %s343_s3 = inlined_call_operand.hbm [shape: f32[16,32], index: 3, kind: output, shape index: {}]  }
   0x1   :  { %9 = vsyncpa [#allocation6], 0 }
   0x2   :  { %10 = vsyncpa [#allocation4], 0  ;;  %s263_s12 = smov [#allocation2]   ;;  %s191_s16 = scalar_lea.hbm %s340_s0, 256 }
   0x3   :  { %s16_s13 = sshll.u32 %s263_s12, 4  ;;  %p192_p0 = scmp.ne.s32.totalorder %s340_s0, %s191_s16  ;;  %s17_s13 = int_to_ptr.vmem [resolvable:$true] %s16_s13 }
   0x4   :  { %p195_p1 = scmp.lt.u32.totalorder %s191_s16, %s340_s0 }
   0x6   :  { %p197_p2 = pnand %p195_p1, %p192_p0 }
   0x8   :  { %200 = shalt.err (!%p197_p2)
}
   0x9   :  { %s201_s21 = scalar_lea.vmem %s17_s13, 256  ;;  %p206_p4 = scmp.lt.s32.totalorder %s17_s13, %s17_s13 }
   0xa   :  { %p202_p3 = scmp.ne.s32.totalorder %s17_s13, %s201_s21  ;;  %p207_p5 = scmp.lt.s32.totalorder %s201_s21, %s201_s21 }
   0xc   :  { %p208_p6 = por %p207_p5, %p206_p4 }
   0xe   :  { %p209_p7 = pnand %p208_p6, %p202_p3 }
  0x10   :  { %212 = shalt.err (!%p209_p7)
}
  0x11   :  { %s264_s22 = smov 128   ;;  %s265_s23 = smov 8  }
  0x12   :  { %22 = dma.hbm_to_vmem [thread:$0]  %s340_s0, 256, %s17_s13, [#allocation3], %s264_s22, %s264_s22, %s265_s23  }
  0x13   :  { %s266_s26 = smov [#allocation5]   ;;  %s213_s30 = scalar_lea.hbm %s341_s1, 512 }
  0x14   :  { %s28_s27 = sshll.u32 %s266_s26, 4  ;;  %p214_p8 = scmp.ne.s32.totalorder %s341_s1, %s213_s30  ;;  %s29_s27 = int_to_ptr.vmem [resolvable:$true] %s28_s27 }
  0x15   :  { %p217_p9 = scmp.lt.u32.totalorder %s213_s30, %s341_s1 }
  0x17   :  { %p219_p10 = pnand %p217_p9, %p214_p8 }
  0x19   :  { %222 = shalt.err (!%p219_p10)
}
  0x1a   :  { %s223_s8 = scalar_lea.vmem %s29_s27, 512  ;;  %p228_p12 = scmp.lt.s32.totalorder %s29_s27, %s29_s27 }
  0x1b   :  { %p224_p11 = scmp.ne.s32.totalorder %s29_s27, %s223_s8  ;;  %p229_p13 = scmp.lt.s32.totalorder %s223_s8, %s223_s8 }
  0x1d   :  { %p230_p0 = por %p229_p13, %p228_p12 }
  0x1f   :  { %p231_p1 = pnand %p230_p0, %p224_p11 }
  0x21   :  { %234 = shalt.err (!%p231_p1)
}
  0x22   :  { %34 = dma.hbm_to_vmem [thread:$0]  %s341_s1, 512, %s29_s27, [#allocation6], %s264_s22, %s264_s22, %s265_s23  }
  0x23   :  { %257 = dma.done.wait [#allocation3], 256  }
  0x24   :  { %258 = vsyncadd [#allocation3], 4294967040 }
  0x25   :  { %259 = dma.done.wait [#allocation6], 512  }
  0x26   :  { %260 = vsyncadd [#allocation6], 4294966784  ;;  %vm56_vm0 = vcmask 261120   ;;  %v45_v0 = vld [vmem:[#allocation5] sm:$0xff]  ;;  %v46_v1 = vld [vmem:[#allocation5 + $0x8] sm:$0xff]  ;;  %s267_s11 = smov [#allocation7]  }
  0x27   :  { %v47_v2 = vld [vmem:[#allocation5 + $0x10] sm:$0xff]  ;;  %v178_v3 = vpack.c.bf16 %v46_v1, %v45_v0  ;;  %v48_v4 = vld [vmem:[#allocation5 + $0x18] sm:$0xff]  ;;  %s145_s12 = sshll.u32 %s267_s11, 4  ;;  %s146_s12 = int_to_ptr.vmem [resolvable:$true] %s145_s12 }
  0x28   :  { %v43_v5 = vld [vmem:[#allocation2] sm:$0xff]  ;;  %v182_v6 = vpack.c.bf16 %v48_v4, %v47_v2  ;;  %v44_v7 = vld [vmem:[#allocation2 + $0x8] sm:$0xff]  ;;  %s235_s13 = scalar_lea.vmem %s146_s12, 256  ;;  %p240_p3 = scmp.lt.s32.totalorder %s146_s12, %s146_s12 }
  0x29   :  { %175 = vmatprep.mubr.msk.f32.mxu0 %vm56_vm0, %v43_v5  ;;  %179 = vmatprep.subr.bf16.mxu0 %v178_v3  ;;  %v158_v8 = vld [vmem:[%s342_s2] ss:$0 sm:$0xff]  ;;  %p236_p2 = scmp.ne.s32.totalorder %s146_s12, %s235_s13  ;;  %p241_p4 = scmp.lt.s32.totalorder %s235_s13, %s235_s13 }
  0x2a   :  { %181 = vmatpush3.bf16.msra.mxu0 %v178_v3 }
  0x2b   :  { %183 = vmatprep.subr.bf16.mxu0 %v182_v6  ;;  %p242_p5 = por %p241_p4, %p240_p3 }
  0x2d   :  { %p243_p6 = pnand %p242_p5, %p236_p2 }
  0x2e   :  { %185 = vmatpush3.bf16.msra.mxu0 %v182_v6 }
  0x31   :  { %176 = vmatmul.mubr.msk.f32.vlgmr.msra.gmra.mrb[0].mxu0 %vm56_vm0, %v44_v7 }
 0x104   :  { %v177_v9 = vpop.f32.mrb[0].mxu0 }
 0x105   :  { %v135_v10 = vadd.f32 %v177_v9, %v158_v8  ;;  %v129_v11 = vpop.f32.mrb[1].mxu0 }
 0x106   :  { %v130_v12 = vadd.f32 %v158_v8, %v129_v11 }
 0x107   :  { %139 = vst.msk [vmem:[#allocation7 + $0x8] sm:$0xff] %vm56_vm0, %v135_v10 }
 0x108   :  { %138 = vst.msk [vmem:[#allocation7] sm:$0xff] %vm56_vm0, %v130_v12 }
 0x109   :  { %246 = shalt.err (!%p243_p6)
}
 0x10a   :  { %s247_s15 = scalar_lea.hbm %s343_s3, 256 }
 0x10b   :  { %p248_p7 = scmp.ne.s32.totalorder %s343_s3, %s247_s15  ;;  %p251_p8 = scmp.lt.u32.totalorder %s247_s15, %s343_s3 }
 0x10d   :  { %p253_p9 = pnand %p251_p8, %p248_p7 }
 0x10f   :  { %256 = shalt.err (!%p253_p9)
}
 0x110   :  { %151 = dma.vmem_to_hbm [thread:$0]  %s146_s12, 256, %s343_s3, [#allocation4], %s264_s22, %s264_s22, %s265_s23  }
 0x111   :  { %261 = dma.done.wait [#allocation4], 256  }
 0x112   :  { %262 = vsyncadd [#allocation4], 4294967040 }
 0x113   :  { %155 = vsyncpa [#allocation3], 1 }
 0x114   :  { %156 = vsyncpa [#allocation6], 1 }
 0x115   :  { %157 = vsyncpa [#allocation4], 1 }

</bundles_post_ra>
